<compile_context>
chip_gen: v6e
topology: v6e:2x2x1
jax: 0.10.0
libtpu: 0.0.40
codegen_flags: <defaults>
</compile_context>

<pallas_src>
import functools

import jax
import jax.numpy as jnp
from jax.experimental import pallas as pl
from jax.experimental.pallas import tpu as pltpu


def _cdiv(a: int, b: int) -> int:
    return -(-a // b)


def _round_up(a: int, m: int) -> int:
    return _cdiv(a, m) * m


def _device_kind() -> str:
    try:
        return jax.devices()[0].device_kind.lower()
    except Exception:  # pragma: no cover - CPU/interpret fallback
        return ""


def _prenorm_kernel(x_ref, o_ref, *, scale, bias, num_channels, compute_dtype):
    # x_ref / o_ref: (row_block, lane_block) tile of the (N*C, H*W) slab.
    rb = x_ref.shape[0]

    # Per-row (rb, 1) constants from compile-time immediates.  channel = row % C;
    # out-of-range tail rows are masked by Pallas on writeback, so this is
    # correct for every block of a cdiv grid.
    s = jnp.full((rb, 1), scale[num_channels - 1], dtype=compute_dtype)
    b = jnp.full((rb, 1), bias[num_channels - 1], dtype=compute_dtype)
    if num_channels > 1:
        row0 = pl.program_id(0) * rb
        row_ids = row0 + jax.lax.broadcasted_iota(jnp.int32, (rb, 1), 0)
        ch = row_ids % num_channels
        for c in range(num_channels - 1):
            s = jnp.where(ch == c, jnp.asarray(scale[c], compute_dtype), s)
            b = jnp.where(ch == c, jnp.asarray(bias[c], compute_dtype), b)

    x = x_ref[...].astype(compute_dtype)
    # FMA form of (x - mean) / std.
    o_ref[...] = (x * s - b).astype(o_ref.dtype)


def _choose_blocks(rows: int, hw: int, in_itemsize: int, out_itemsize: int):
    """Lane-dense blocks for a cdiv grid, capped for VMEM, sized for both TCs."""
    itemsize = max(in_itemsize, out_itemsize)
    max_block_bytes = 4 * 1024 * 1024      # hard cap per block (v7x-safe)
    target_block_bytes = 2 * 1024 * 1024   # ~2 MiB blocks amortize step overhead

    # Lane (last-dim) block: whole rows when they fit (one contiguous DMA
    # segment per row), else a wide multiple of 128 (tail block is masked).
    if hw * itemsize * 8 <= max_block_bytes:
        lane_block = hw                                   # full extent: always legal
    else:
        cap = max(128, (max_block_bytes // (8 * itemsize)) // 128 * 128)
        lane_block = min(_round_up(hw, 128), cap)

    # Row (sublane) block: fill towards the target; multiple of 8 or full extent.
    target_rows = max(8, target_block_bytes // (lane_block * itemsize))
    if rows <= target_rows:
        row_block = rows                                  # full extent: always legal
    else:
        cap_rows = max_block_bytes // (lane_block * itemsize)
        row_block = max(8, (min(target_rows, cap_rows) // 8) * 8)

    # v7x has 2 TensorCores: make sure the parallel grid has enough steps to
    # feed both (shrink rows rather than accept a 1-2 step grid).
    num_lane_blocks = _cdiv(hw, lane_block)
    num_row_blocks = _cdiv(rows, row_block)
    min_steps = 8
    if num_row_blocks * num_lane_blocks < min_steps and row_block > 8:
        want_row_blocks = min(_cdiv(min_steps, num_lane_blocks), _cdiv(rows, 8))
        row_block = max(8, _round_up(_cdiv(rows, want_row_blocks), 8))
        num_row_blocks = _cdiv(rows, row_block)

    return row_block, lane_block, num_row_blocks, num_lane_blocks


def prenorm(x_nchw: jax.Array,
            pixel_mean=(0.485, 0.456, 0.406),
            pixel_std=(0.229, 0.224, 0.225),
            donate_input: bool = False) -> jax.Array:
    N, C, H, W = x_nchw.shape
    assert len(pixel_mean) == C and len(pixel_std) == C
    HW = H * W
    ROWS = N * C

    kind = _device_kind()

    # Output is always floating point (uint8 image inputs are a common case).
    if jnp.issubdtype(x_nchw.dtype, jnp.floating):
        out_dtype = x_nchw.dtype
    else:
        out_dtype = jnp.float32

    # bf16 math only where the VPU has bf16 (v6e/v7x); f32 everywhere else.
    if x_nchw.dtype == jnp.bfloat16 and "v5" not in kind:
        compute_dtype = jnp.bfloat16
    else:
        compute_dtype = jnp.float32

    # Compile-time constants (FMA form): out = x * inv_std - mean * inv_std.
    scale = tuple(1.0 / float(s) for s in pixel_std)
    bias = tuple(float(m) / float(s) for m, s in zip(pixel_mean, pixel_std))

    # Free reshape (row-major NCHW): rows index (n, c), lanes index spatial.
    x2 = x_nchw.reshape(ROWS, HW)

    in_itemsize = jnp.dtype(x_nchw.dtype).itemsize
    out_itemsize = jnp.dtype(out_dtype).itemsize
    row_block, lane_block, n_row_blocks, n_lane_blocks = _choose_blocks(
        ROWS, HW, in_itemsize, out_itemsize)
    grid = (n_row_blocks, n_lane_blocks)

    # Generation-aware VMEM headroom: v5e/v6e have 128 MiB physical VMEM
    # (v5e's scoped default is only 16 MiB, so an explicit limit is mandatory);
    # v7x has 64 MiB, so stay at 32 MiB scoped there.
    if "v5" in kind or "v6" in kind:
        vmem_limit = 64 * 1024 * 1024
    else:
        vmem_limit = 32 * 1024 * 1024

    kernel = functools.partial(
        _prenorm_kernel, scale=scale, bias=bias, num_channels=C,
        compute_dtype=compute_dtype)

    io_aliases = {}
    if donate_input and out_dtype == x_nchw.dtype:
        io_aliases = {0: 0}

    out = pl.pallas_call(
        kernel,
        out_shape=jax.ShapeDtypeStruct((ROWS, HW), out_dtype),
        grid_spec=pltpu.PrefetchScalarGridSpec(
            num_scalar_prefetch=0,
            grid=grid,
            in_specs=[pl.BlockSpec((row_block, lane_block), lambda i, j: (i, j))],
            out_specs=pl.BlockSpec((row_block, lane_block), lambda i, j: (i, j)),
        ),
        input_output_aliases=io_aliases,
        compiler_params=pltpu.CompilerParams(
            dimension_semantics=("parallel", "parallel"),
            vmem_limit_bytes=vmem_limit,
        ),
    )(x2)

    return out.reshape(N, C, H, W)


if __name__ == "__main__":
    key = jax.random.PRNGKey(0)
    # NCHW input, 3 channels to match the (1, 3, 1, 1) mean/std buffers.
    x = jax.random.uniform(key, (2, 3, 16, 16), dtype=jnp.float32)

    y = prenorm(x)
    y = jax.block_until_ready(y)

    # Reference check (plain JAX, matches the PyTorch forward).
    mean = jnp.array([0.485, 0.456, 0.406], jnp.float32).reshape(1, 3, 1, 1)
    std = jnp.array([0.229, 0.224, 0.225], jnp.float32).reshape(1, 3, 1, 1)
    ref = (x - mean) / std
    assert y.dtype == x.dtype and y.shape == x.shape
    assert jnp.allclose(y, ref, atol=1e-5, rtol=1e-5), "mismatch vs reference"

    print("KERNEL_OK")
</pallas_src>

<mosaic_0001>
module attributes {stable_mosaic.version = 11 : i64} {
  func.func @_prenorm_kernel(%arg0: i32, %arg1: i32, %arg2: memref<6x256xf32, #tpu.memory_space<vmem>>, %arg3: memref<6x256xf32, #tpu.memory_space<vmem>>) attributes {dimension_semantics = [#tpu.dimension_semantics<parallel>, #tpu.dimension_semantics<parallel>], iteration_bounds = array<i64: 1, 1>, scalar_prefetch = 0 : i64, scratch_operands = 0 : i64, tpu.core_type = #tpu.core_type<tc>, window_params = [{transform_indices = @transform_0, window_bounds = array<i64: 6, 256>}, {transform_indices = @transform_1, window_bounds = array<i64: 6, 256>}]} {
    %cst = arith.constant 4.44444466 : f32
    %0 = vector.broadcast %cst : f32 to vector<6x1xf32>
    %cst_0 = arith.constant 1.80444443 : f32
    %1 = vector.broadcast %cst_0 : f32 to vector<6x1xf32>
    %c6_i32 = arith.constant 6 : i32
    %2 = arith.muli %arg0, %c6_i32 : i32
    %3 = tpu.iota {dimensions = array<i32: 0>} : vector<6x1xi32>
    %4 = vector.broadcast %2 : i32 to vector<6x1xi32>
    %5 = arith.addi %4, %3 : vector<6x1xi32>
    %c3_i32 = arith.constant 3 : i32
    %c0_i32 = arith.constant 0 : i32
    %6 = arith.cmpi eq, %c3_i32, %c0_i32 : i32
    %c1_i32 = arith.constant 1 : i32
    %7 = arith.select %6, %c1_i32, %c3_i32 : i32
    %8 = vector.broadcast %7 : i32 to vector<6x1xi32>
    %9 = arith.remsi %5, %8 : vector<6x1xi32>
    %c0_i32_1 = arith.constant 0 : i32
    %10 = vector.broadcast %c0_i32_1 : i32 to vector<6x1xi32>
    %11 = arith.cmpi ne, %9, %10 : vector<6x1xi32>
    %c0_i32_2 = arith.constant 0 : i32
    %12 = vector.broadcast %c0_i32_2 : i32 to vector<6x1xi32>
    %13 = arith.cmpi slt, %9, %12 : vector<6x1xi32>
    %c0_i32_3 = arith.constant 0 : i32
    %14 = arith.cmpi slt, %7, %c0_i32_3 : i32
    %15 = vector.broadcast %14 : i1 to vector<6x1xi1>
    %16 = vector.broadcast %15 : vector<6x1xi1> to vector<6x1xi1>
    %17 = arith.xori %13, %16 : vector<6x1xi1>
    %18 = arith.andi %17, %11 : vector<6x1xi1>
    %19 = vector.broadcast %7 : i32 to vector<6x1xi32>
    %20 = arith.addi %9, %19 : vector<6x1xi32>
    %21 = arith.select %18, %20, %9 : vector<6x1xi1>, vector<6x1xi32>
    %c0_i32_4 = arith.constant 0 : i32
    %22 = vector.broadcast %c0_i32_4 : i32 to vector<6x1xi32>
    %23 = arith.cmpi eq, %21, %22 : vector<6x1xi32>
    %cst_5 = arith.constant 4.36681223 : f32
    %24 = vector.broadcast %cst_5 : f32 to vector<6x1xf32>
    %25 = arith.select %23, %24, %0 : vector<6x1xi1>, vector<6x1xf32>
    %c0_i32_6 = arith.constant 0 : i32
    %26 = vector.broadcast %c0_i32_6 : i32 to vector<6x1xi32>
    %27 = arith.cmpi eq, %21, %26 : vector<6x1xi32>
    %cst_7 = arith.constant 2.11790395 : f32
    %28 = vector.broadcast %cst_7 : f32 to vector<6x1xf32>
    %29 = arith.select %27, %28, %1 : vector<6x1xi1>, vector<6x1xf32>
    %c1_i32_8 = arith.constant 1 : i32
    %30 = vector.broadcast %c1_i32_8 : i32 to vector<6x1xi32>
    %31 = arith.cmpi eq, %21, %30 : vector<6x1xi32>
    %cst_9 = arith.constant 4.46428585 : f32
    %32 = vector.broadcast %cst_9 : f32 to vector<6x1xf32>
    %33 = arith.select %31, %32, %25 : vector<6x1xi1>, vector<6x1xf32>
    %c1_i32_10 = arith.constant 1 : i32
    %34 = vector.broadcast %c1_i32_10 : i32 to vector<6x1xi32>
    %35 = arith.cmpi eq, %21, %34 : vector<6x1xi32>
    %cst_11 = arith.constant 2.03571439 : f32
    %36 = vector.broadcast %cst_11 : f32 to vector<6x1xf32>
    %37 = arith.select %35, %36, %29 : vector<6x1xi1>, vector<6x1xf32>
    %c0 = arith.constant 0 : index
    %c0_12 = arith.constant 0 : index
    %38 = vector.load %arg2[%c0, %c0_12] : memref<6x256xf32, #tpu.memory_space<vmem>>, vector<6x256xf32>
    %39 = vector.broadcast %33 : vector<6x1xf32> to vector<6x256xf32>
    %40 = arith.mulf %38, %39 : vector<6x256xf32>
    %41 = vector.broadcast %37 : vector<6x1xf32> to vector<6x256xf32>
    %42 = arith.subf %40, %41 : vector<6x256xf32>
    %c0_13 = arith.constant 0 : index
    %c0_14 = arith.constant 0 : index
    %43 = vector.load %arg3[%c0_13, %c0_14] : memref<6x256xf32, #tpu.memory_space<vmem>>, vector<6x256xf32>
    tpu.vector_store %arg3[%c0_13, %c0_14], %42 {strides = array<i32>} : memref<6x256xf32, #tpu.memory_space<vmem>>, vector<6x256xf32>,
    return
  }
  func.func @transform_0(%arg0: i32, %arg1: i32) -> (i32, i32) {
    %c0_i32 = arith.constant 0 : i32
    return %arg0, %arg1 : i32, i32
  }
  func.func @transform_1(%arg0: i32, %arg1: i32) -> (i32, i32) {
    %c0_i32 = arith.constant 0 : i32
    return %arg0, %arg1 : i32, i32
  }
}

</mosaic_0001>

<bundles_post_ra>
// kernel: tpu_custom_call.1
= control target key start
LH: loop header
LB: loop body
LE: loop exit
PB: predicated region body
PF: predicated region fallthrough
CT: control target
= control target key end

     0   :  { %6 = vsyncpa [#allocation3], 0  ;;  %s145_s0 = inlined_call_operand.hbm [shape: f32[6,256], index: 0, kind: input, shape index: {}]   ;;  %s146_s1 = inlined_call_operand.hbm [shape: f32[6,256], index: 1, kind: output, shape index: {}]  }
   0x1   :  { %7 = vsyncpa [#allocation4], 0  ;;  %s121_s6 = smov [#allocation2]  }
   0x2   :  { %s14_s7 = sshll.u32 %s121_s6, 4  ;;  %s15_s7 = int_to_ptr.vmem [resolvable:$true] %s14_s7 }
   0x3   :  { %s85_s8 = scalar_lea.vmem %s15_s7, 256  ;;  %p90_p1 = scmp.lt.s32.totalorder %s15_s7, %s15_s7 }
   0x4   :  { %p86_p0 = scmp.ne.s32.totalorder %s15_s7, %s85_s8  ;;  %p91_p2 = scmp.lt.s32.totalorder %s85_s8, %s85_s8 }
   0x6   :  { %p92_p3 = por %p91_p2, %p90_p1 }
   0x8   :  { %p93_p4 = pnand %p92_p3, %p86_p0 }
   0xa   :  { %96 = shalt.err (!%p93_p4)
}
   0xb   :  { %17 = dma.hbm_to_vmem [thread:$0]  %s145_s0, 256, %s15_s7, [#allocation3]  }
   0xc   :  { %117 = dma.done.wait [#allocation3], 256  }
   0xd   :  { %118 = vsyncadd [#allocation3], 4294967040  ;;  %v22_v0 = vlaneseq  ;;  %v48_v9 = vld [vmem:[#allocation2] sm:$0x3f]  ;;  %v49_v10 = vld [vmem:[#allocation2 + $0x8] sm:$0x3f] }
   0xe   :  { %v122_v11 = vmov 4.4444447   ;;  %v123_v13 = vmov 1.8044444   ;;  %s124_s0 = smov [#allocation5]  }
   0xf   :  { %v23_v1 = vshrl.u32 %v22_v0, 7  ;;  %s62_s11 = sshll.u32 %s124_s0, 4  ;;  %s63_s11 = int_to_ptr.vmem [resolvable:$true] %s62_s11 }
  0x10   :  { %s97_s12 = scalar_lea.vmem %s63_s11, 256  ;;  %p102_p6 = scmp.lt.s32.totalorder %s63_s11, %s63_s11 }
  0x11   :  { %v138_v2 = vmul.u32.u64.low 2863311531, %v23_v1  ;;  %v139_v3 = vmul.u32.u64.high 2863311531, %v23_v1, %v138_v2  ;;  %p98_p5 = scmp.ne.s32.totalorder %s63_s11, %s97_s12  ;;  %p103_p7 = scmp.lt.s32.totalorder %s97_s12, %s97_s12 }
  0x13   :  { %v32_v4 = vshrl.u32 %v139_v3, 1  ;;  %p104_p8 = por %p103_p7, %p102_p6 }
  0x15   :  { %v33_v5 = vmul.u32 3, %v32_v4  ;;  %p105_p9 = pnand %p104_p8, %p98_p5 }
  0x17   :  { %v34_v6 = vsub.s32 %v23_v1, %v33_v5 }
  0x19   :  { %vm37_vm0 = vcmp.ne.s32.totalorder %v34_v6, 0  ;;  %vm38_vm1 = vcmp.lt.s32.totalorder %v34_v6, 0  ;;  %v40_v7 = vadd.s32 3, %v34_v6 }
  0x1a   :  { %vm39_vm2 = vmand %vm38_vm1, %vm37_vm0 }
  0x1b   :  { %v41_v8 = vsel %vm39_vm2, %v40_v7, %v34_v6 }
  0x1c   :  { %vm42_vm3 = vcmp.eq.s32.totalorder %v41_v8, 0  ;;  %vm45_vm4 = vcmp.eq.s32.totalorder %v41_v8, 1 }
  0x1d   :  { %v43_v12 = vsel %vm42_vm3, 4.366812, %v122_v11  ;;  %v44_v14 = vsel %vm42_vm3, 2.117904, %v123_v13 }
  0x1e   :  { %v46_v15 = vsel %vm45_vm4, 4.464286, %v43_v12  ;;  %v47_v16 = vsel %vm45_vm4, 2.0357144, %v44_v14 }
  0x1f   :  { %v50_v17 = vmul.f32 %v48_v9, %v46_v15  ;;  %v51_v18 = vmul.f32 %v49_v10, %v46_v15 }
  0x21   :  { %v52_v19 = vsub.f32 %v50_v17, %v47_v16  ;;  %v53_v20 = vsub.f32 %v51_v18, %v47_v16 }
  0x23   :  { %54 = vst [vmem:[#allocation5] sm:$0x3f] %v52_v19  ;;  %55 = vst [vmem:[#allocation5 + $0x8] sm:$0x3f] %v53_v20 }
  0x24   :  { %108 = shalt.err (!%p105_p9)
}
  0x25   :  { %65 = dma.vmem_to_hbm [thread:$0]  %s63_s11, 256, %s146_s1, [#allocation4]  }
  0x26   :  { %119 = dma.done.wait [#allocation4], 256  }
  0x27   :  { %120 = vsyncadd [#allocation4], 4294967040 }
  0x28   :  { %69 = vsyncpa [#allocation3], 1 }
  0x29   :  { %70 = vsyncpa [#allocation4], 1 }

</bundles_post_ra>
